<compile_context>
chip_gen: v6e
topology: v6e:2x2x1
jax: 0.10.0
libtpu: 0.0.40
codegen_flags: <defaults>
</compile_context>

<pallas_src>
import jax
import jax.numpy as jnp
from jax import lax
from jax.experimental import pallas as pl
from jax.experimental.pallas import tpu as pltpu


# Raises v5e's 16 MiB scoped-VMEM default; stays well inside v6e's 128 MiB and
# v7x's 64 MiB physical VMEM (blocks are capped at ~2 MiB each, so the
# double-buffered footprint is far below this limit on every generation).
_VMEM_LIMIT = 32 * 1024 * 1024
_LN_EPS = 1e-5


def _silu(x):
    # Manual SiLU (x * sigmoid(x)) using only exp/divide so it lowers cleanly
    # in Mosaic; used identically in the kernels and in the JAX reference.
    return x * (1.0 / (1.0 + jnp.exp(-x)))


# ----------------------------------------------------------------------------
# Row-tiled launcher: big lane-dense blocks, resident small operands.
# ----------------------------------------------------------------------------
def _pick_row_tile(rows, max_cols, itemsize, target_bytes=2 * 1024 * 1024):
    """~target_bytes per block; dtype-aware sublane multiple; full-dim if small."""
    min_sub = {4: 8, 2: 16, 1: 32}.get(itemsize, 8)
    rt = (target_bytes // max(1, max_cols * itemsize)) // min_sub * min_sub
    rt = max(int(rt), min_sub)
    return rows if rt >= rows else rt


def _row_tiled_call(kernel, row_inputs, resident_inputs, out_shape):
    """Launch `kernel(row_refs..., resident_refs..., out_ref)` over row tiles.

    row_inputs:      2-D (rows, K_i) arrays tiled along rows (ragged tail OK).
    resident_inputs: 2-D arrays with a constant block index -> loaded into
                     VMEM once and kept resident for the whole grid.
    """
    rows = row_inputs[0].shape[0]
    max_cols = max([a.shape[1] for a in row_inputs] + [out_shape[1]])
    itemsize = max(a.dtype.itemsize for a in row_inputs)
    rt = _pick_row_tile(rows, max_cols, itemsize)
    grid = (pl.cdiv(rows, rt),)

    in_specs = (
        [pl.BlockSpec((rt, a.shape[1]), lambda i: (i, 0)) for a in row_inputs]
        + [pl.BlockSpec(a.shape, lambda i: (0, 0)) for a in resident_inputs]
    )
    return pl.pallas_call(
        kernel,
        out_shape=jax.ShapeDtypeStruct(out_shape, row_inputs[0].dtype),
        grid_spec=pltpu.PrefetchScalarGridSpec(
            num_scalar_prefetch=0,
            grid=grid,
            in_specs=in_specs,
            out_specs=pl.BlockSpec((rt, out_shape[1]), lambda i: (i, 0)),
        ),
        compiler_params=pltpu.CompilerParams(
            dimension_semantics=("parallel",),   # shards across v7x's 2 TCs
            vmem_limit_bytes=_VMEM_LIMIT,
        ),
    )(*row_inputs, *resident_inputs)


# ----------------------------------------------------------------------------
# Kernels
# ----------------------------------------------------------------------------
def _make_linear_kernel(silu):
    """y = x @ W + b (+ optional fused SiLU).  W, b are VMEM-resident."""
    def kernel(x_ref, w_ref, b_ref, o_ref):
        y = jnp.dot(x_ref[...], w_ref[...],
                    preferred_element_type=jnp.float32) + b_ref[...]
        if silu:
            y = _silu(y)
        o_ref[...] = y.astype(o_ref.dtype)
    return kernel


def _make_ln_linear_kernel(silu):
    """Fused LayerNorm (over the lane/channel axis) + Linear (+ optional SiLU)."""
    def kernel(x_ref, g_ref, beta_ref, w_ref, b_ref, o_ref):
        x = x_ref[...].astype(jnp.float32)
        mu = jnp.mean(x, axis=-1, keepdims=True)
        xc = x - mu
        var = jnp.mean(xc * xc, axis=-1, keepdims=True)
        xn = xc * lax.rsqrt(var + _LN_EPS) * g_ref[...] + beta_ref[...]
        y = jnp.dot(xn, w_ref[...],
                    preferred_element_type=jnp.float32) + b_ref[...]
        if silu:
            y = _silu(y)
        o_ref[...] = y.astype(o_ref.dtype)
    return kernel


def _out_proj_kernel(att_ref, xp_ref, w_ref, b_ref, o_ref):
    """out_proj(att + SiLU(x_proj)): the add + SiLU are fused into the matmul."""
    inp = att_ref[...] + _silu(xp_ref[...])
    y = jnp.dot(inp, w_ref[...], preferred_element_type=jnp.float32) + b_ref[...]
    o_ref[...] = y.astype(o_ref.dtype)


def _fc2_scale_residual_kernel(h_ref, x_ref, w_ref, b_ref, s_ref, o_ref):
    """MLP fc2 with the ElementScale multiply and the `+ x_in` residual fused
    as the epilogue (no standalone element-scale kernel)."""
    y = jnp.dot(h_ref[...], w_ref[...],
                preferred_element_type=jnp.float32) + b_ref[...]
    o_ref[...] = (y * s_ref[...] + x_ref[...]).astype(o_ref.dtype)


def _dwconv3x3_kernel(xpad_ref, w_ref, o_ref):
    """Depthwise 3x3 conv, one batch element per grid step (NHWC, pre-padded).
    Only full-block loads + static value slices inside the kernel."""
    _, hh, ww, cd = o_ref.shape
    xp = xpad_ref[0].astype(jnp.float32)          # (hh+2, ww+2, cd)
    wts = w_ref[...]                              # (9, cd)
    acc = jnp.zeros((hh, ww, cd), jnp.float32)
    for ky in range(3):
        for kx in range(3):
            tap = lax.slice(xp, (ky, kx, 0), (ky + hh, kx + ww, cd))
            acc = acc + tap * wts[3 * ky + kx: 3 * ky + kx + 1, :]
    o_ref[0] = acc.astype(o_ref.dtype)


def _dwconv3x3(x_nhwc, w9):
    b, hh, ww, cd = x_nhwc.shape
    # Zero padding is part of the conv semantics; doing it once here keeps the
    # kernel free of in-kernel scatter / unaligned ref stores.
    xpad = jnp.pad(x_nhwc, ((0, 0), (1, 1), (1, 1), (0, 0)))
    return pl.pallas_call(
        _dwconv3x3_kernel,
        out_shape=jax.ShapeDtypeStruct((b, hh, ww, cd), x_nhwc.dtype),
        grid_spec=pltpu.PrefetchScalarGridSpec(
            num_scalar_prefetch=0,
            grid=(b,),
            in_specs=[pl.BlockSpec((1, hh + 2, ww + 2, cd),
                                   lambda i: (i, 0, 0, 0)),
                      pl.BlockSpec((9, cd), lambda i: (0, 0))],
            out_specs=pl.BlockSpec((1, hh, ww, cd), lambda i: (i, 0, 0, 0)),
        ),
        compiler_params=pltpu.CompilerParams(
            dimension_semantics=("parallel",),
            vmem_limit_bytes=_VMEM_LIMIT,
        ),
    )(xpad, w9)


def _make_attention_kernel(num_heads, d_inner):
    hd = d_inner // num_heads
    scale = d_inner ** (-0.5)   # matches PyTorch: self.dim ** -0.5 (full dim)

    def kernel(q_ref, kv_ref, o_ref):
        q = q_ref[0]                                  # (L, d_inner)
        kv = kv_ref[0]                                # (L, 2*d_inner)
        outs = []
        for h in range(num_heads):
            qh = q[:, h * hd:(h + 1) * hd]
            kh = kv[:, h * hd:(h + 1) * hd]
            vh = kv[:, d_inner + h * hd: d_inner + (h + 1) * hd]
            s = lax.dot_general(qh, kh, (((1,), (1,)), ((), ())),
                                preferred_element_type=jnp.float32) * scale
            s = s - jnp.max(s, axis=-1, keepdims=True)
            p = jnp.exp(s)
            p = p / jnp.sum(p, axis=-1, keepdims=True)
            outs.append(jnp.dot(p, vh, preferred_element_type=jnp.float32))
        o_ref[0] = jnp.concatenate(outs, axis=-1).astype(o_ref.dtype)

    return kernel


def _dsr_attention(q_tok, kv_tok, num_heads):
    b, l, d_inner = q_tok.shape
    # TODO(synk): for large L (= H*W) the per-batch (L, L) score block should be
    # replaced by a flash-style streamed softmax; fine for the shapes used here.
    return pl.pallas_call(
        _make_attention_kernel(num_heads, d_inner),
        out_shape=jax.ShapeDtypeStruct((b, l, d_inner), q_tok.dtype),
        grid_spec=pltpu.PrefetchScalarGridSpec(
            num_scalar_prefetch=0,
            grid=(b,),
            in_specs=[pl.BlockSpec((1, l, d_inner), lambda i: (i, 0, 0)),
                      pl.BlockSpec((1, l, 2 * d_inner), lambda i: (i, 0, 0))],
            out_specs=pl.BlockSpec((1, l, d_inner), lambda i: (i, 0, 0)),
        ),
        compiler_params=pltpu.CompilerParams(
            dimension_semantics=("parallel",),
            vmem_limit_bytes=_VMEM_LIMIT,
        ),
    )(q_tok, kv_tok)


# ----------------------------------------------------------------------------
# Full DeepSemanticRefineBlock forward (Pallas)
# ----------------------------------------------------------------------------
def deep_semantic_refine_block(x_in, change_map, p, *, num_heads):
    b, c, hh, ww = x_in.shape
    l = hh * ww
    dim = c
    d_inner = p["in_proj_w"].shape[1]

    # NCHW -> token-major (B*L, C); mirrors the module's permutes (layout only).
    x_tok = x_in.reshape(b, c, l).transpose(0, 2, 1).reshape(b * l, c)
    cm_tok = change_map.reshape(b, c, l).transpose(0, 2, 1).reshape(b * l, c)

    # LayerNorm + in_proj (fused)
    x_proj = _row_tiled_call(
        _make_ln_linear_kernel(silu=False),
        [x_tok],
        [p["norm_g"], p["norm_b"], p["in_proj_w"], p["in_proj_b"]],
        (b * l, d_inner))

    # change_in_proj
    cm_proj = _row_tiled_call(
        _make_linear_kernel(silu=False),
        [cm_tok],
        [p["cin_proj_w"], p["cin_proj_b"]],
        (b * l, d_inner))

    # depthwise 3x3 conv on the projected features (NHWC view)
    x_conv = _dwconv3x3(x_proj.reshape(b, hh, ww, d_inner), p["dw_w"])
    x_conv_tok = x_conv.reshape(b * l, d_inner)

    # attention: q = SiLU(to_q(dwconv(x))), k,v = SiLU(to_kv(change_proj))
    q = _row_tiled_call(_make_linear_kernel(silu=True),
                        [x_conv_tok], [p["q_w"], p["q_b"]], (b * l, d_inner))
    kv = _row_tiled_call(_make_linear_kernel(silu=True),
                         [cm_proj], [p["kv_w"], p["kv_b"]], (b * l, 2 * d_inner))
    att = _dsr_attention(q.reshape(b, l, d_inner),
                         kv.reshape(b, l, 2 * d_inner),
                         num_heads).reshape(b * l, d_inner)

    # out_proj(att + SiLU(x_proj)).
    # TODO(synk): train-time stochastic DropPath / Dropout not implemented
    # (identity at the module defaults drop=0.0, drop_path=0.0).
    z = _row_tiled_call(_out_proj_kernel,
                        [att, x_proj], [p["out_w"], p["out_b"]], (b * l, dim))

    # MLP branch: norm2 + fc1 + SiLU fused; fc2 with fused ElementScale+residual.
    h1 = _row_tiled_call(
        _make_ln_linear_kernel(silu=True),
        [z],
        [p["norm2_g"], p["norm2_b"], p["fc1_w"], p["fc1_b"]],
        (b * l, p["fc1_w"].shape[1]))
    out_tok = _row_tiled_call(
        _fc2_scale_residual_kernel,
        [h1, x_tok],
        [p["fc2_w"], p["fc2_b"], p["scale"]],
        (b * l, dim))

    # token-major -> NCHW
    return out_tok.reshape(b, l, c).transpose(0, 2, 1).reshape(b, c, hh, ww)


# ----------------------------------------------------------------------------
# Pure-JAX reference (mirrors the PyTorch forward)
# ----------------------------------------------------------------------------
def _reference_forward(x_in, change_map, p, *, num_heads):
    b, c, hh, ww = x_in.shape
    l = hh * ww
    d_inner = p["in_proj_w"].shape[1]

    def ln(t, g, bb):
        mu = t.mean(-1, keepdims=True)
        var = ((t - mu) ** 2).mean(-1, keepdims=True)
        return (t - mu) / jnp.sqrt(var + _LN_EPS) * g + bb

    x_tok = x_in.reshape(b, c, l).transpose(0, 2, 1)
    cm_tok = change_map.reshape(b, c, l).transpose(0, 2, 1)

    xp = ln(x_tok, p["norm_g"], p["norm_b"]) @ p["in_proj_w"] + p["in_proj_b"]
    cmp_ = cm_tok @ p["cin_proj_w"] + p["cin_proj_b"]
    act_res = _silu(xp)

    xi = xp.reshape(b, hh, ww, d_inner)
    xpad = jnp.pad(xi, ((0, 0), (1, 1), (1, 1), (0, 0)))
    conv = jnp.zeros_like(xi)
    for ky in range(3):
        for kx in range(3):
            conv = conv + xpad[:, ky:ky + hh, kx:kx + ww, :] * p["dw_w"][3 * ky + kx]
    xc = conv.reshape(b, l, d_inner)

    q = _silu(xc @ p["q_w"] + p["q_b"])
    kv = _silu(cmp_ @ p["kv_w"] + p["kv_b"])
    k_, v_ = kv[..., :d_inner], kv[..., d_inner:]

    hd = d_inner // num_heads

    def split(t):
        return t.reshape(b, l, num_heads, hd).transpose(0, 2, 1, 3)

    qh, kh, vh = split(q), split(k_), split(v_)
    s = jnp.einsum("bhqd,bhkd->bhqk", qh, kh) * (d_inner ** -0.5)
    wgt = jax.nn.softmax(s, axis=-1)
    att = jnp.einsum("bhqk,bhkd->bhqd", wgt, vh)
    att = att.transpose(0, 2, 1, 3).reshape(b, l, d_inner)

    z = (att + act_res) @ p["out_w"] + p["out_b"]
    zn = ln(z, p["norm2_g"], p["norm2_b"])
    h1 = _silu(zn @ p["fc1_w"] + p["fc1_b"])
    z = h1 @ p["fc2_w"] + p["fc2_b"]
    out_tok = z * p["scale"] + x_tok
    return out_tok.transpose(0, 2, 1).reshape(b, c, hh, ww)


if __name__ == "__main__":
    # DeepSemanticRefineBlock config (small, consistent with the module):
    # dim=32, num_heads=4, changeguide_ratio=1.0 -> d_inner=32, d_conv=3,
    # mlp_ratio=4.0 -> hidden=128, act_layer=SiLU, ElementScale init=1e-4.
    B, DIM, H, W = 2, 32, 8, 8
    NUM_HEADS = 4
    D_INNER = DIM                 # changeguide_ratio = 1.0 (depthwise conv valid)
    HIDDEN = int(DIM * 4.0)

    key = jax.random.PRNGKey(0)
    ks = jax.random.split(key, 17)
    f32 = jnp.float32

    def w_init(k, shape, fan_in):
        return jax.random.normal(k, shape, f32) / jnp.sqrt(jnp.asarray(fan_in, f32))

    params = {
        "norm_g": jnp.ones((1, DIM), f32),
        "norm_b": jnp.zeros((1, DIM), f32),
        "in_proj_w": w_init(ks[0], (DIM, D_INNER), DIM),
        "in_proj_b": 0.01 * jax.random.normal(ks[1], (1, D_INNER), f32),
        "cin_proj_w": w_init(ks[2], (DIM, D_INNER), DIM),
        "cin_proj_b": 0.01 * jax.random.normal(ks[3], (1, D_INNER), f32),
        "dw_w": 0.1 * jax.random.normal(ks[4], (9, D_INNER), f32),
        "q_w": w_init(ks[5], (D_INNER, D_INNER), D_INNER),
        "q_b": 0.01 * jax.random.normal(ks[6], (1, D_INNER), f32),
        "kv_w": w_init(ks[7], (D_INNER, 2 * D_INNER), D_INNER),
        "kv_b": 0.01 * jax.random.normal(ks[8], (1, 2 * D_INNER), f32),
        "out_w": w_init(ks[9], (D_INNER, DIM), D_INNER),
        "out_b": 0.01 * jax.random.normal(ks[10], (1, DIM), f32),
        "norm2_g": jnp.ones((1, DIM), f32),
        "norm2_b": jnp.zeros((1, DIM), f32),
        "fc1_w": w_init(ks[11], (DIM, HIDDEN), DIM),
        "fc1_b": 0.01 * jax.random.normal(ks[12], (1, HIDDEN), f32),
        "fc2_w": w_init(ks[13], (HIDDEN, DIM), HIDDEN),
        "fc2_b": 0.01 * jax.random.normal(ks[14], (1, DIM), f32),
        # ElementScale(embed_dims=dim, init_value=0.0001)
        "scale": 1e-4 * jnp.ones((1, DIM), f32),
    }

    x_in = jax.random.normal(ks[15], (B, DIM, H, W), f32)
    change_map = jax.random.normal(ks[16], (B, DIM, H, W), f32)

    y = deep_semantic_refine_block(x_in, change_map, params, num_heads=NUM_HEADS)
    y = jax.block_until_ready(y)

    y_ref = _reference_forward(x_in, change_map, params, num_heads=NUM_HEADS)
    assert y.shape == x_in.shape
    max_err = float(jnp.max(jnp.abs(y - y_ref)))
    assert jnp.allclose(y, y_ref, atol=1e-5, rtol=1e-5), max_err

    print("KERNEL_OK")
</pallas_src>

<mosaic_0001>
module attributes {stable_mosaic.version = 11 : i64} {
  func.func @kernel(%arg0: i32, %arg1: memref<128x32xf32, #tpu.memory_space<vmem>>, %arg2: memref<1x32xf32, #tpu.memory_space<vmem>>, %arg3: memref<1x32xf32, #tpu.memory_space<vmem>>, %arg4: memref<32x32xf32, #tpu.memory_space<vmem>>, %arg5: memref<1x32xf32, #tpu.memory_space<vmem>>, %arg6: memref<128x32xf32, #tpu.memory_space<vmem>>) attributes {dimension_semantics = [#tpu.dimension_semantics<parallel>], iteration_bounds = array<i64: 1>, scalar_prefetch = 0 : i64, scratch_operands = 0 : i64, tpu.core_type = #tpu.core_type<tc>, window_params = [{transform_indices = @transform_0, window_bounds = array<i64: 128, 32>}, {pipeline_mode = #tpu.pipeline_mode<synchronous>, transform_indices = @transform_1, window_bounds = array<i64: 1, 32>}, {pipeline_mode = #tpu.pipeline_mode<synchronous>, transform_indices = @transform_2, window_bounds = array<i64: 1, 32>}, {pipeline_mode = #tpu.pipeline_mode<synchronous>, transform_indices = @transform_3, window_bounds = array<i64: 32, 32>}, {pipeline_mode = #tpu.pipeline_mode<synchronous>, transform_indices = @transform_4, window_bounds = array<i64: 1, 32>}, {transform_indices = @transform_5, window_bounds = array<i64: 128, 32>}]} {
    %c0 = arith.constant 0 : index
    %c0_0 = arith.constant 0 : index
    %0 = vector.load %arg1[%c0, %c0_0] : memref<128x32xf32, #tpu.memory_space<vmem>>, vector<128x32xf32>
    %cst = arith.constant dense<0.000000e+00> : vector<128xf32>
    %1 = vector.multi_reduction <add>, %0, %cst [1] : vector<128x32xf32> to vector<128xf32>
    %2 = vector.shape_cast %1 : vector<128xf32> to vector<128x1xf32>
    %cst_1 = arith.constant 3.200000e+01 : f32
    %3 = vector.broadcast %cst_1 : f32 to vector<128x1xf32>
    %4 = arith.divf %2, %3 : vector<128x1xf32>
    %5 = vector.broadcast %4 : vector<128x1xf32> to vector<128x32xf32>
    %6 = arith.subf %0, %5 : vector<128x32xf32>
    %7 = arith.mulf %6, %6 : vector<128x32xf32>
    %cst_2 = arith.constant dense<0.000000e+00> : vector<128xf32>
    %8 = vector.multi_reduction <add>, %7, %cst_2 [1] : vector<128x32xf32> to vector<128xf32>
    %9 = vector.shape_cast %8 : vector<128xf32> to vector<128x1xf32>
    %cst_3 = arith.constant 3.200000e+01 : f32
    %10 = vector.broadcast %cst_3 : f32 to vector<128x1xf32>
    %11 = arith.divf %9, %10 : vector<128x1xf32>
    %cst_4 = arith.constant 9.99999974E-6 : f32
    %12 = vector.broadcast %cst_4 : f32 to vector<128x1xf32>
    %13 = arith.addf %11, %12 : vector<128x1xf32>
    %14 = math.rsqrt %13 : vector<128x1xf32>
    %15 = vector.broadcast %14 : vector<128x1xf32> to vector<128x32xf32>
    %16 = arith.mulf %6, %15 : vector<128x32xf32>
    %c0_5 = arith.constant 0 : index
    %c0_6 = arith.constant 0 : index
    %17 = vector.load %arg2[%c0_5, %c0_6] : memref<1x32xf32, #tpu.memory_space<vmem>>, vector<1x32xf32>
    %18 = vector.broadcast %17 : vector<1x32xf32> to vector<128x32xf32>
    %19 = arith.mulf %16, %18 : vector<128x32xf32>
    %c0_7 = arith.constant 0 : index
    %c0_8 = arith.constant 0 : index
    %20 = vector.load %arg3[%c0_7, %c0_8] : memref<1x32xf32, #tpu.memory_space<vmem>>, vector<1x32xf32>
    %21 = vector.broadcast %20 : vector<1x32xf32> to vector<128x32xf32>
    %22 = arith.addf %19, %21 : vector<128x32xf32>
    %c0_9 = arith.constant 0 : index
    %c0_10 = arith.constant 0 : index
    %23 = vector.load %arg4[%c0_9, %c0_10] : memref<32x32xf32, #tpu.memory_space<vmem>>, vector<32x32xf32>
    %cst_11 = arith.constant dense<0.000000e+00> : vector<128x32xf32>
    %24 = tpu.matmul %22, %23, %cst_11 {dimension_numbers = #tpu.dot_dimension_numbers<[1], [0], [0], [1], [0, 0, 1, 1], [], []>} : vector<128x32xf32>, vector<32x32xf32>, vector<128x32xf32> -> vector<128x32xf32>
    %c0_12 = arith.constant 0 : index
    %c0_13 = arith.constant 0 : index
    %25 = vector.load %arg5[%c0_12, %c0_13] : memref<1x32xf32, #tpu.memory_space<vmem>>, vector<1x32xf32>
    %26 = vector.broadcast %25 : vector<1x32xf32> to vector<128x32xf32>
    %27 = arith.addf %24, %26 : vector<128x32xf32>
    %c0_14 = arith.constant 0 : index
    %c0_15 = arith.constant 0 : index
    %28 = vector.load %arg6[%c0_14, %c0_15] : memref<128x32xf32, #tpu.memory_space<vmem>>, vector<128x32xf32>
    tpu.vector_store %arg6[%c0_14, %c0_15], %27 {strides = array<i32>} : memref<128x32xf32, #tpu.memory_space<vmem>>, vector<128x32xf32>,
    return
  }
  func.func @transform_0(%arg0: i32) -> (i32, i32) {
    %c0_i32 = arith.constant 0 : i32
    %c0_i32_0 = arith.constant 0 : i32
    return %arg0, %c0_i32 : i32, i32
  }
  func.func @transform_1(%arg0: i32) -> (i32, i32) {
    %c0_i32 = arith.constant 0 : i32
    %c0_i32_0 = arith.constant 0 : i32
    %c0_i32_1 = arith.constant 0 : i32
    return %c0_i32, %c0_i32_0 : i32, i32
  }
  func.func @transform_2(%arg0: i32) -> (i32, i32) {
    %c0_i32 = arith.constant 0 : i32
    %c0_i32_0 = arith.constant 0 : i32
    %c0_i32_1 = arith.constant 0 : i32
    return %c0_i32, %c0_i32_0 : i32, i32
  }
  func.func @transform_3(%arg0: i32) -> (i32, i32) {
    %c0_i32 = arith.constant 0 : i32
    %c0_i32_0 = arith.constant 0 : i32
    %c0_i32_1 = arith.constant 0 : i32
    return %c0_i32, %c0_i32_0 : i32, i32
  }
  func.func @transform_4(%arg0: i32) -> (i32, i32) {
    %c0_i32 = arith.constant 0 : i32
    %c0_i32_0 = arith.constant 0 : i32
    %c0_i32_1 = arith.constant 0 : i32
    return %c0_i32, %c0_i32_0 : i32, i32
  }
  func.func @transform_5(%arg0: i32) -> (i32, i32) {
    %c0_i32 = arith.constant 0 : i32
    %c0_i32_0 = arith.constant 0 : i32
    return %arg0, %c0_i32 : i32, i32
  }
}

</mosaic_0001>

<bundles_post_ra>
// kernel: tpu_custom_call.1
= control target key start
LH: loop header
LB: loop body
LE: loop exit
PB: predicated region body
PF: predicated region fallthrough
CT: control target
= control target key end

     0   :  { %vm36_vm0 = vcmask 261120   ;;  %s994_s0 = inlined_call_operand.vmem [shape: f32[128,32], index: 0, kind: input, shape index: {}]   ;;  %s995_s3 = inlined_call_operand.vmem [shape: f32[32,32], index: 3, kind: input, shape index: {}]   ;;  %s996_s1 = inlined_call_operand.vmem [shape: f32[1,32], index: 1, kind: input, shape index: {}]   ;;  %s997_s2 = inlined_call_operand.vmem [shape: f32[1,32], index: 2, kind: input, shape index: {}]   ;;  %s998_s4 = inlined_call_operand.vmem [shape: f32[1,32], index: 4, kind: input, shape index: {}]   ;;  %s999_s5 = inlined_call_operand.vmem [shape: f32[128,32], index: 5, kind: output, shape index: {}]  }
   0x1   :  { %v20_v0 = vld [vmem:[%s994_s0] sm:$0xff]  ;;  %v21_v1 = vld [vmem:[%s994_s0 + $0x8] sm:$0xff]  ;;  %v22_v8 = vld [vmem:[%s994_s0 + $0x10] sm:$0xff] }
   0x2   :  { %v28_v2 = vld [vmem:[%s994_s0 + $0x40] sm:$0xff]  ;;  %v37_v3 = vsel %vm36_vm0, %v20_v0, 0.0  ;;  %v40_v4 = vsel %vm36_vm0, %v21_v1, 0.0  ;;  %v29_v5 = vld [vmem:[%s994_s0 + $0x48] sm:$0xff]  ;;  %v30_v9 = vld [vmem:[%s994_s0 + $0x50] sm:$0xff]  ;;  %v43_v10 = vsel %vm36_vm0, %v22_v8, 0.0 }
   0x3   :  { %38 = vadd.xlane.f32.xlu0 %v37_v3  ;;  %41 = vadd.xlane.f32.xlu1 %v40_v4  ;;  %v61_v6 = vsel %vm36_vm0, %v28_v2, 0.0  ;;  %v64_v7 = vsel %vm36_vm0, %v29_v5, 0.0  ;;  %v67_v11 = vsel %vm36_vm0, %v30_v9, 0.0  ;;  %v684_v12 = vld [vmem:[%s994_s0 + $0x18] sm:$0xff]  ;;  %v698_v16 = vld [vmem:[%s994_s0 + $0x20] sm:$0xff]  ;;  %v712_v20 = vld [vmem:[%s994_s0 + $0x28] sm:$0xff] }
   0x4   :  { %v689_v13 = vld [vmem:[%s994_s0 + $0x58] sm:$0xff]  ;;  %v46_v14 = vsel %vm36_vm0, %v684_v12, 0.0  ;;  %v703_v17 = vld [vmem:[%s994_s0 + $0x60] sm:$0xff]  ;;  %v49_v18 = vsel %vm36_vm0, %v698_v16, 0.0  ;;  %v717_v21 = vld [vmem:[%s994_s0 + $0x68] sm:$0xff]  ;;  %v52_v22 = vsel %vm36_vm0, %v712_v20, 0.0 }
   0x5   :  { %v70_v15 = vsel %vm36_vm0, %v689_v13, 0.0  ;;  %v73_v19 = vsel %vm36_vm0, %v703_v17, 0.0  ;;  %v76_v23 = vsel %vm36_vm0, %v717_v21, 0.0  ;;  %v726_v24 = vld [vmem:[%s994_s0 + $0x30] sm:$0xff]  ;;  %v740_v28 = vld [vmem:[%s994_s0 + $0x38] sm:$0xff] }
   0x6   :  { %v731_v25 = vld [vmem:[%s994_s0 + $0x70] sm:$0xff]  ;;  %v55_v26 = vsel %vm36_vm0, %v726_v24, 0.0  ;;  %v745_v29 = vld [vmem:[%s994_s0 + $0x78] sm:$0xff]  ;;  %v58_v30 = vsel %vm36_vm0, %v740_v28, 0.0 }
   0x7   :  { %62 = vadd.xlane.f32.xlu0 %v61_v6  ;;  %65 = vadd.xlane.f32.xlu1 %v64_v7  ;;  %v79_v27 = vsel %vm36_vm0, %v731_v25, 0.0  ;;  %v82_v31 = vsel %vm36_vm0, %v745_v29, 0.0 }
   0xb   :  { %44 = vadd.xlane.f32.xlu0 %v43_v10  ;;  %68 = vadd.xlane.f32.xlu1 %v67_v11 }
   0xf   :  { %47 = vadd.xlane.f32.xlu0 %v46_v14  ;;  %71 = vadd.xlane.f32.xlu1 %v70_v15 }
  0x13   :  { %50 = vadd.xlane.f32.xlu0 %v49_v18  ;;  %74 = vadd.xlane.f32.xlu1 %v73_v19 }
  0x17   :  { %53 = vadd.xlane.f32.xlu0 %v52_v22  ;;  %77 = vadd.xlane.f32.xlu1 %v76_v23 }
  0x1b   :  { %56 = vadd.xlane.f32.xlu0 %v55_v26  ;;  %80 = vadd.xlane.f32.xlu1 %v79_v27 }
  0x1f   :  { %59 = vadd.xlane.f32.xlu0 %v58_v30  ;;  %83 = vadd.xlane.f32.xlu1 %v82_v31 }
  0x8c   :  { %v39_v32 = vpop.xlane.xlu0 %38  ;;  %v42_v33 = vpop.xlane.xlu1 %41 }
  0x8d   :  { %v86_v34 = vmul.f32 0.03125, %v39_v32  ;;  %v87_v35 = vmul.f32 0.03125, %v42_v33 }
  0x8f   :  { %v751_v36 = vsub.f32 %v20_v0, %v86_v34  ;;  %v753_v37 = vsub.f32 %v21_v1, %v87_v35 }
  0x90   :  { %v63_v38 = vpop.xlane.xlu0 %62  ;;  %v66_v39 = vpop.xlane.xlu1 %65 }
  0x91   :  { %v94_v40 = vmul.f32 0.03125, %v63_v38  ;;  %v95_v41 = vmul.f32 0.03125, %v66_v39  ;;  %v118_v42 = vmul.f32 %v751_v36, %v751_v36  ;;  %v119_v43 = vmul.f32 %v753_v37, %v753_v37 }
  0x93   :  { %v759_v44 = vsub.f32 %v28_v2, %v94_v40  ;;  %v761_v45 = vsub.f32 %v29_v5, %v95_v41  ;;  %v134_v46 = vsel %vm36_vm0, %v118_v42, 0.0  ;;  %v137_v49 = vsel %vm36_vm0, %v119_v43, 0.0 }
  0x94   :  { %135 = vadd.xlane.f32.xlu0 %v134_v46  ;;  %v45_v47 = vpop.xlane.xlu0 %44  ;;  %v69_v48 = vpop.xlane.xlu1 %68 }
  0x95   :  { %v88_v50 = vmul.f32 0.03125, %v45_v47  ;;  %v96_v51 = vmul.f32 0.03125, %v69_v48  ;;  %v126_v52 = vmul.f32 %v759_v44, %v759_v44  ;;  %v127_v53 = vmul.f32 %v761_v45, %v761_v45 }
  0x97   :  { %v769_v54 = vsub.f32 %v22_v8, %v88_v50  ;;  %v771_v55 = vsub.f32 %v30_v9, %v96_v51  ;;  %v158_v56 = vsel %vm36_vm0, %v126_v52, 0.0  ;;  %v161_v59 = vsel %vm36_vm0, %v127_v53, 0.0  ;;  %v294_v53 = vld [vmem:[%s995_s3 + $0x10] sm:$0xff] }
  0x98   :  { %138 = vadd.xlane.f32.xlu0 %v137_v49  ;;  %159 = vadd.xlane.f32.xlu1 %v158_v56  ;;  %v48_v57 = vpop.xlane.xlu0 %47  ;;  %v72_v58 = vpop.xlane.xlu1 %71  ;;  %v293_v56 = vld [vmem:[%s995_s3 + $0x8] sm:$0xff] }
  0x99   :  { %v89_v60 = vmul.f32 0.03125, %v48_v57  ;;  %v97_v61 = vmul.f32 0.03125, %v72_v58  ;;  %v120_v62 = vmul.f32 %v769_v54, %v769_v54  ;;  %v128_v63 = vmul.f32 %v771_v55, %v771_v55  ;;  %v292_v57 = vld [vmem:[%s995_s3] sm:$0xff] }
  0x9b   :  { %v780_v0 = vsub.f32 %v684_v12, %v89_v60  ;;  %v783_v1 = vsub.f32 %v689_v13, %v97_v61  ;;  %v140_v2 = vsel %vm36_vm0, %v120_v62, 0.0  ;;  %v164_v5 = vsel %vm36_vm0, %v128_v63, 0.0 }
  0x9c   :  { %162 = vadd.xlane.f32.xlu1 %v161_v59  ;;  %141 = vadd.xlane.f32.xlu0 %v140_v2  ;;  %v51_v3 = vpop.xlane.xlu0 %50  ;;  %v75_v4 = vpop.xlane.xlu1 %74 }
  0x9d   :  { %v90_v6 = vmul.f32 0.03125, %v51_v3  ;;  %v98_v7 = vmul.f32 0.03125, %v75_v4  ;;  %v121_v8 = vmul.f32 %v780_v0, %v780_v0  ;;  %v129_v9 = vmul.f32 %v783_v1, %v783_v1 }
  0x9f   :  { %v792_v10 = vsub.f32 %v698_v16, %v90_v6  ;;  %v795_v11 = vsub.f32 %v703_v17, %v98_v7  ;;  %v143_v12 = vsel %vm36_vm0, %v121_v8, 0.0  ;;  %v167_v15 = vsel %vm36_vm0, %v129_v9, 0.0 }
  0xa0   :  { %165 = vadd.xlane.f32.xlu1 %v164_v5  ;;  %144 = vadd.xlane.f32.xlu0 %v143_v12  ;;  %v54_v13 = vpop.xlane.xlu0 %53  ;;  %v78_v14 = vpop.xlane.xlu1 %77 }
  0xa1   :  { %v91_v18 = vmul.f32 0.03125, %v54_v13  ;;  %v99_v19 = vmul.f32 0.03125, %v78_v14  ;;  %v122_v22 = vmul.f32 %v792_v10, %v792_v10  ;;  %v130_v16 = vmul.f32 %v795_v11, %v795_v11 }
  0xa3   :  { %v804_v23 = vsub.f32 %v712_v20, %v91_v18  ;;  %v807_v17 = vsub.f32 %v717_v21, %v99_v19  ;;  %v146_v26 = vsel %vm36_vm0, %v122_v22, 0.0  ;;  %v170_v31 = vsel %vm36_vm0, %v130_v16, 0.0 }
  0xa4   :  { %168 = vadd.xlane.f32.xlu1 %v167_v15  ;;  %147 = vadd.xlane.f32.xlu0 %v146_v26  ;;  %v57_v27 = vpop.xlane.xlu0 %56  ;;  %v81_v30 = vpop.xlane.xlu1 %80 }
  0xa5   :  { %v92_v32 = vmul.f32 0.03125, %v57_v27  ;;  %v100_v33 = vmul.f32 0.03125, %v81_v30  ;;  %v123_v34 = vmul.f32 %v804_v23, %v804_v23  ;;  %v131_v20 = vmul.f32 %v807_v17, %v807_v17 }
  0xa7   :  { %v816_v35 = vsub.f32 %v726_v24, %v92_v32  ;;  %v819_v21 = vsub.f32 %v731_v25, %v100_v33  ;;  %v149_v38 = vsel %vm36_vm0, %v123_v34, 0.0  ;;  %v173_v41 = vsel %vm36_vm0, %v131_v20, 0.0  ;;  %v856_v32 = vld [vmem:[%s996_s1] ss:$0 sm:$0xff] }
  0xa8   :  { %171 = vadd.xlane.f32.xlu1 %v170_v31  ;;  %150 = vadd.xlane.f32.xlu0 %v149_v38  ;;  %v60_v39 = vpop.xlane.xlu0 %59  ;;  %v84_v40 = vpop.xlane.xlu1 %83 }
  0xa9   :  { %v93_v42 = vmul.f32 0.03125, %v60_v39  ;;  %v101_v43 = vmul.f32 0.03125, %v84_v40  ;;  %v124_v46 = vmul.f32 %v816_v35, %v816_v35  ;;  %v132_v24 = vmul.f32 %v819_v21, %v819_v21  ;;  %v862_v40 = vld [vmem:[%s997_s2] ss:$0 sm:$0xff] }
  0xab   :  { %v828_v47 = vsub.f32 %v740_v28, %v93_v42  ;;  %v831_v25 = vsub.f32 %v745_v29, %v101_v43  ;;  %v152_v48 = vsel %vm36_vm0, %v124_v46, 0.0  ;;  %v176_v49 = vsel %vm36_vm0, %v132_v24, 0.0  ;;  %v295_v29 = vld [vmem:[%s995_s3 + $0x18] sm:$0xff] }
  0xac   :  { %174 = vadd.xlane.f32.xlu1 %v173_v41  ;;  %153 = vadd.xlane.f32.xlu0 %v152_v48 }
  0xad   :  { %v125_v50 = vmul.f32 %v828_v47, %v828_v47  ;;  %v133_v51 = vmul.f32 %v831_v25, %v831_v25  ;;  %555 = vmatprep.subr.mxu0 %v295_v29  ;;  %587 = vmatprep.subr.mxu1 %v295_v29 }
  0xae   :  { %556 = vmatpush3.msra.mxu0 %v295_v29  ;;  %591 = vmatpush3.msra.mxu1 %v295_v29 }
  0xaf   :  { %v155_v52 = vsel %vm36_vm0, %v125_v50, 0.0  ;;  %v179_v28 = vsel %vm36_vm0, %v133_v51, 0.0  ;;  %557 = vmatprep.subr.mxu0 %v294_v53  ;;  %588 = vmatprep.subr.mxu1 %v294_v53 }
  0xb0   :  { %177 = vadd.xlane.f32.xlu1 %v176_v49  ;;  %156 = vadd.xlane.f32.xlu0 %v155_v52 }
  0xb1   :  { %558 = vmatpush3.msra.mxu0 %v294_v53  ;;  %592 = vmatpush3.msra.mxu1 %v294_v53 }
  0xb2   :  { %559 = vmatprep.subr.mxu0 %v293_v56  ;;  %589 = vmatprep.subr.mxu1 %v293_v56 }
  0xb3   :  { %560 = vmatpush3.msra.mxu0 %v293_v56  ;;  %593 = vmatpush3.msra.mxu1 %v293_v56 }
  0xb4   :  { %180 = vadd.xlane.f32.xlu1 %v179_v28  ;;  %561 = vmatprep.subr.mxu0 %v292_v57 }
  0xb5   :  { %562 = vmatpush3.msra.mxu0 %v292_v57  ;;  %590 = vmatprep.subr.mxu1 %v292_v57 }
  0xb6   :  { %594 = vmatpush3.msra.mxu1 %v292_v57 }
 0x11d   :  { %v136_v58 = vpop.xlane.xlu0 %135 }
 0x11e   :  { %v182_v59 = vmul.f32 0.03125, %v136_v58 }
 0x120   :  { %v198_v60 = vadd.f32 1e-05, %v182_v59 }
 0x121   :  { %v160_v61 = vpop.xlane.xlu1 %159  ;;  %v139_v62 = vpop.xlane.xlu0 %138 }
 0x122   :  { %595 = vrsqrt.f32 %v198_v60  ;;  %v190_v63 = vmul.f32 0.03125, %v160_v61  ;;  %v183_v2 = vmul.f32 0.03125, %v139_v62 }
 0x124   :  { %v206_v3 = vadd.f32 1e-05, %v190_v63  ;;  %v199_v4 = vadd.f32 1e-05, %v183_v2 }
 0x125   :  { %v163_v5 = vpop.xlane.xlu1 %162  ;;  %v142_v6 = vpop.xlane.xlu0 %141 }
 0x126   :  { %597 = vrsqrt.f32 %v206_v3  ;;  %v191_v7 = vmul.f32 0.03125, %v163_v5  ;;  %v184_v8 = vmul.f32 0.03125, %v142_v6 }
 0x127   :  { %599 = vrsqrt.f32 %v199_v4 }
 0x128   :  { %v207_v9 = vadd.f32 1e-05, %v191_v7  ;;  %v200_v12 = vadd.f32 1e-05, %v184_v8 }
 0x129   :  { %v166_v13 = vpop.xlane.xlu1 %165  ;;  %v145_v14 = vpop.xlane.xlu0 %144 }
 0x12a   :  { %601 = vrsqrt.f32 %v207_v9  ;;  %v192_v15 = vmul.f32 0.03125, %v166_v13  ;;  %v185_v18 = vmul.f32 0.03125, %v145_v14 }
 0x12b   :  { %603 = vrsqrt.f32 %v200_v12 }
 0x12c   :  { %v208_v19 = vadd.f32 1e-05, %v192_v15  ;;  %v201_v22 = vadd.f32 1e-05, %v185_v18 }
 0x12d   :  { %v169_v16 = vpop.xlane.xlu1 %168  ;;  %v148_v26 = vpop.xlane.xlu0 %147 }
 0x12e   :  { %605 = vrsqrt.f32 %v208_v19  ;;  %v193_v27 = vmul.f32 0.03125, %v169_v16  ;;  %v186_v30 = vmul.f32 0.03125, %v148_v26 }
 0x12f   :  { %v596_v31 = vpop.eup %595  ;;  %607 = vrsqrt.f32 %v201_v22 }
 0x130   :  { %v209_v33 = vadd.f32 1e-05, %v193_v27  ;;  %v202_v34 = vadd.f32 1e-05, %v186_v30  ;;  %v230_v20 = vmul.f32 %v596_v31, %v751_v36 }
 0x131   :  { %v172_v38 = vpop.xlane.xlu1 %171  ;;  %v151_v39 = vpop.xlane.xlu0 %150 }
 0x132   :  { %609 = vrsqrt.f32 %v209_v33  ;;  %v194_v41 = vmul.f32 0.03125, %v172_v38  ;;  %v187_v42 = vmul.f32 0.03125, %v151_v39  ;;  %v253_v43 = vmul.f32 %v856_v32, %v230_v20 }
 0x133   :  { %v598_v46 = vpop.eup %597  ;;  %611 = vrsqrt.f32 %v202_v34 }
 0x134   :  { %v600_v24 = vpop.eup %599  ;;  %v210_v48 = vadd.f32 1e-05, %v194_v41  ;;  %v203_v49 = vadd.f32 1e-05, %v187_v42  ;;  %v276_v50 = vadd.f32 %v862_v40, %v253_v43  ;;  %v238_v36 = vmul.f32 %v598_v46, %v759_v44 }
 0x135   :  { %v175_v51 = vpop.xlane.xlu1 %174  ;;  %v154_v52 = vpop.xlane.xlu0 %153  ;;  %v231_v28 = vmul.f32 %v600_v24, %v753_v37 }
 0x136   :  { %613 = vrsqrt.f32 %v210_v48  ;;  %v195_v29 = vmul.f32 0.03125, %v175_v51  ;;  %v188_v53 = vmul.f32 0.03125, %v154_v52  ;;  %563 = vmatprep.mubr.msk.f32.mxu0 %vm36_vm0, %v276_v50  ;;  %v261_v56 = vmul.f32 %v856_v32, %v238_v36 }
 0x137   :  { %v602_v57 = vpop.eup %601  ;;  %615 = vrsqrt.f32 %v203_v49  ;;  %v254_v58 = vmul.f32 %v856_v32, %v231_v28 }
 0x138   :  { %v604_v59 = vpop.eup %603  ;;  %v211_v60 = vadd.f32 1e-05, %v195_v29  ;;  %v204_v61 = vadd.f32 1e-05, %v188_v53  ;;  %v284_v44 = vadd.f32 %v862_v40, %v261_v56  ;;  %v239_v62 = vmul.f32 %v602_v57, %v761_v45 }
 0x139   :  { %v178_v63 = vpop.xlane.xlu1 %177  ;;  %v157_v37 = vpop.xlane.xlu0 %156  ;;  %v277_v2 = vadd.f32 %v862_v40, %v254_v58  ;;  %v232_v3 = vmul.f32 %v604_v59, %v769_v54 }
 0x13a   :  { %617 = vrsqrt.f32 %v211_v60  ;;  %v196_v4 = vmul.f32 0.03125, %v178_v63  ;;  %v189_v5 = vmul.f32 0.03125, %v157_v37  ;;  %575 = vmatprep.mubr.msk.f32.mxu1 %vm36_vm0, %v284_v44  ;;  %v262_v6 = vmul.f32 %v856_v32, %v239_v62  ;;  %v518_v44 = vld [vmem:[%s998_s4] ss:$0 sm:$0xff] }
 0x13b   :  { %v606_v7 = vpop.eup %605  ;;  %619 = vrsqrt.f32 %v204_v61  ;;  %564 = vmatmul.mubr.msk.f32.vlgmr.msra.gmra.mxu0 %vm36_vm0, %v277_v2  ;;  %v255_v8 = vmul.f32 %v856_v32, %v232_v3 }
 0x13c   :  { %v608_v45 = vpop.eup %607  ;;  %v212_v9 = vadd.f32 1e-05, %v196_v4  ;;  %v205_v12 = vadd.f32 1e-05, %v189_v5  ;;  %v285_v13 = vadd.f32 %v862_v40, %v262_v6  ;;  %v240_v54 = vmul.f32 %v606_v7, %v771_v55 }
 0x13d   :  { %v181_v14 = vpop.xlane.xlu1 %180  ;;  %v278_v15 = vadd.f32 %v862_v40, %v255_v8  ;;  %v233_v18 = vmul.f32 %v608_v45, %v780_v0 }
 0x13e   :  { %621 = vrsqrt.f32 %v212_v9  ;;  %v197_v19 = vmul.f32 0.03125, %v181_v14  ;;  %576 = vmatmul.mubr.msk.f32.vlgmr.msra.gmra.mxu1 %vm36_vm0, %v285_v13  ;;  %v263_v22 = vmul.f32 %v856_v32, %v240_v54 }
 0x13f   :  { %v610_v16 = vpop.eup %609  ;;  %623 = vrsqrt.f32 %v205_v12  ;;  %566 = vmatprep.mubr.msk.f32.mxu0 %vm36_vm0, %v278_v15  ;;  %v256_v26 = vmul.f32 %v856_v32, %v233_v18 }
 0x140   :  { %v612_v27 = vpop.eup %611  ;;  %v213_v30 = vadd.f32 1e-05, %v197_v19  ;;  %v286_v55 = vadd.f32 %v862_v40, %v263_v22  ;;  %v241_v31 = vmul.f32 %v610_v16, %v783_v1 }
 0x141   :  { %v279_v0 = vadd.f32 %v862_v40, %v256_v26  ;;  %v234_v33 = vmul.f32 %v612_v27, %v792_v10 }
 0x142   :  { %625 = vrsqrt.f32 %v213_v30  ;;  %578 = vmatprep.mubr.msk.f32.mxu1 %vm36_vm0, %v286_v55  ;;  %v264_v34 = vmul.f32 %v856_v32, %v241_v31 }
 0x143   :  { %v614_v20 = vpop.eup %613  ;;  %567 = vmatmul.mubr.msk.f32.gmra.mxu0 %vm36_vm0, %v279_v0  ;;  %v257_v38 = vmul.f32 %v856_v32, %v234_v33 }
 0x144   :  { %v616_v39 = vpop.eup %615  ;;  %v287_v41 = vadd.f32 %v862_v40, %v264_v34  ;;  %v242_v42 = vmul.f32 %v614_v20, %v795_v11 }
 0x145   :  { %v280_v1 = vadd.f32 %v862_v40, %v257_v38  ;;  %v235_v43 = vmul.f32 %v616_v39, %v804_v23 }
 0x146   :  { %579 = vmatmul.mubr.msk.f32.gmra.mxu1 %vm36_vm0, %v287_v41  ;;  %v265_v10 = vmul.f32 %v856_v32, %v242_v42 }
 0x147   :  { %v618_v46 = vpop.eup %617  ;;  %569 = vmatprep.mubr.msk.f32.mxu0 %vm36_vm0, %v280_v1  ;;  %v258_v24 = vmul.f32 %v856_v32, %v235_v43 }
 0x148   :  { %v620_v48 = vpop.eup %619  ;;  %v288_v49 = vadd.f32 %v862_v40, %v265_v10  ;;  %v243_v50 = vmul.f32 %v618_v46, %v807_v17 }
 0x149   :  { %v281_v11 = vadd.f32 %v862_v40, %v258_v24  ;;  %v236_v36 = vmul.f32 %v620_v48, %v816_v35 }
 0x14a   :  { %581 = vmatprep.mubr.msk.f32.mxu1 %vm36_vm0, %v288_v49  ;;  %v266_v23 = vmul.f32 %v856_v32, %v243_v50 }
 0x14b   :  { %v622_v51 = vpop.eup %621  ;;  %570 = vmatmul.mubr.msk.f32.gmra.mxu0 %vm36_vm0, %v281_v11  ;;  %v259_v52 = vmul.f32 %v856_v32, %v236_v36 }
 0x14c   :  { %v624_v28 = vpop.eup %623  ;;  %v289_v29 = vadd.f32 %v862_v40, %v266_v23  ;;  %v244_v53 = vmul.f32 %v622_v51, %v819_v21 }
 0x14d   :  { %v282_v17 = vadd.f32 %v862_v40, %v259_v52  ;;  %v237_v56 = vmul.f32 %v624_v28, %v828_v47 }
 0x14e   :  { %582 = vmatmul.mubr.msk.f32.gmra.mxu1 %vm36_vm0, %v289_v29  ;;  %v267_v35 = vmul.f32 %v856_v32, %v244_v53 }
 0x14f   :  { %v626_v57 = vpop.eup %625  ;;  %572 = vmatprep.mubr.msk.f32.mxu0 %vm36_vm0, %v282_v17  ;;  %v260_v58 = vmul.f32 %v856_v32, %v237_v56 }
 0x150   :  { %v290_v59 = vadd.f32 %v862_v40, %v267_v35  ;;  %v245_v60 = vmul.f32 %v626_v57, %v831_v25 }
 0x151   :  { %v283_v61 = vadd.f32 %v862_v40, %v260_v58 }
 0x152   :  { %584 = vmatprep.mubr.msk.f32.mxu1 %vm36_vm0, %v290_v59  ;;  %v268_v21 = vmul.f32 %v856_v32, %v245_v60 }
 0x153   :  { %573 = vmatmul.mubr.msk.f32.gmra.mxu0 %vm36_vm0, %v283_v61 }
 0x154   :  { %v291_v47 = vadd.f32 %v862_v40, %v268_v21 }
 0x156   :  { %585 = vmatmul.mubr.msk.f32.gmra.mxu1 %vm36_vm0, %v291_v47 }
 0x1fb   :  { %v565_v62 = vpop.f32.mrf.mxu0 }
 0x1fc   :  { %v423_v63 = vadd.f32 %v565_v62, %v518_v44 }
 0x1fd   :  { %v417_v37 = vpop.f32.mrf.mxu0 }
 0x1fe   :  { %497 = vst.msk [vmem:[%s999_s5 + $0x8] sm:$0xff] %vm36_vm0, %v423_v63  ;;  %v418_v25 = vadd.f32 %v518_v44, %v417_v37  ;;  %v577_v32 = vpop.f32.mrf.mxu1 }
 0x1ff   :  { %v463_v2 = vadd.f32 %v577_v32, %v518_v44 }
 0x200   :  { %496 = vst.msk [vmem:[%s999_s5] sm:$0xff] %vm36_vm0, %v418_v25  ;;  %v457_v40 = vpop.f32.mrf.mxu1 }
 0x201   :  { %505 = vst.msk [vmem:[%s999_s5 + $0x48] sm:$0xff] %vm36_vm0, %v463_v2  ;;  %v458_v3 = vadd.f32 %v518_v44, %v457_v40 }
 0x203   :  { %504 = vst.msk [vmem:[%s999_s5 + $0x40] sm:$0xff] %vm36_vm0, %v458_v3  ;;  %v568_v4 = vpop.f32.mrf.mxu0 }
 0x204   :  { %v433_v5 = vadd.f32 %v568_v4, %v518_v44 }
 0x205   :  { %v427_v6 = vpop.f32.mrf.mxu0 }
 0x206   :  { %499 = vst.msk [vmem:[%s999_s5 + $0x18] sm:$0xff] %vm36_vm0, %v433_v5  ;;  %v428_v7 = vadd.f32 %v518_v44, %v427_v6  ;;  %v580_v8 = vpop.f32.mrf.mxu1 }
 0x207   :  { %v473_v45 = vadd.f32 %v580_v8, %v518_v44 }
 0x208   :  { %498 = vst.msk [vmem:[%s999_s5 + $0x10] sm:$0xff] %vm36_vm0, %v428_v7  ;;  %v467_v9 = vpop.f32.mrf.mxu1 }
 0x209   :  { %507 = vst.msk [vmem:[%s999_s5 + $0x58] sm:$0xff] %vm36_vm0, %v473_v45  ;;  %v468_v12 = vadd.f32 %v518_v44, %v467_v9 }
 0x20b   :  { %506 = vst.msk [vmem:[%s999_s5 + $0x50] sm:$0xff] %vm36_vm0, %v468_v12  ;;  %v571_v13 = vpop.f32.mrf.mxu0 }
 0x20c   :  { %v443_v54 = vadd.f32 %v571_v13, %v518_v44 }
 0x20d   :  { %v437_v14 = vpop.f32.mrf.mxu0 }
 0x20e   :  { %501 = vst.msk [vmem:[%s999_s5 + $0x28] sm:$0xff] %vm36_vm0, %v443_v54  ;;  %v438_v15 = vadd.f32 %v518_v44, %v437_v14  ;;  %v583_v18 = vpop.f32.mrf.mxu1 }
 0x20f   :  { %v483_v19 = vadd.f32 %v583_v18, %v518_v44 }
 0x210   :  { %500 = vst.msk [vmem:[%s999_s5 + $0x20] sm:$0xff] %vm36_vm0, %v438_v15  ;;  %v477_v22 = vpop.f32.mrf.mxu1 }
 0x211   :  { %509 = vst.msk [vmem:[%s999_s5 + $0x68] sm:$0xff] %vm36_vm0, %v483_v19  ;;  %v478_v16 = vadd.f32 %v518_v44, %v477_v22 }
 0x213   :  { %508 = vst.msk [vmem:[%s999_s5 + $0x60] sm:$0xff] %vm36_vm0, %v478_v16  ;;  %v574_v26 = vpop.f32.mrf.mxu0 }
 0x214   :  { %v453_v27 = vadd.f32 %v574_v26, %v518_v44 }
 0x215   :  { %v447_v30 = vpop.f32.mrf.mxu0 }
 0x216   :  { %503 = vst.msk [vmem:[%s999_s5 + $0x38] sm:$0xff] %vm36_vm0, %v453_v27  ;;  %v448_v55 = vadd.f32 %v518_v44, %v447_v30  ;;  %v586_v31 = vpop.f32.mrf.mxu1 }
 0x217   :  { %v493_v0 = vadd.f32 %v586_v31, %v518_v44 }
 0x218   :  { %502 = vst.msk [vmem:[%s999_s5 + $0x30] sm:$0xff] %vm36_vm0, %v448_v55  ;;  %v487_v33 = vpop.f32.mrf.mxu1 }
 0x219   :  { %511 = vst.msk [vmem:[%s999_s5 + $0x78] sm:$0xff] %vm36_vm0, %v493_v0  ;;  %v488_v34 = vadd.f32 %v518_v44, %v487_v33 }
 0x21b   :  { %510 = vst.msk [vmem:[%s999_s5 + $0x70] sm:$0xff] %vm36_vm0, %v488_v34 }

</bundles_post_ra>
